<compile_context>
chip_gen: v6e
topology: v6e:2x2x1
jax: 0.10.0
libtpu: 0.0.40
codegen_flags: <defaults>
</compile_context>

<pallas_src>
import functools

import jax
import jax.numpy as jnp
from jax.experimental import pallas as pl
from jax.experimental.pallas import tpu as pltpu


def _round_up(x, m):
    return ((x + m - 1) // m) * m


def _cdiv(a, b):
    return -(-a // b)


def _lsce_kernel(pred_ref, tgt_ref, loss_ref, cnt_ref, *scratch,
                 n_valid, class_num, tile_m, tile_c, num_c_tiles,
                 label_smoothing, ignore_index, c_ragged):
    i = pl.program_id(0)          # row-tile index ("parallel")
    j = pl.program_id(1)          # class-tile index ("arbitrary", innermost)

    eps = float(label_smoothing) if label_smoothing else 0.0
    on_w = (1.0 - eps) + eps / class_num
    off_w = eps / class_num

    x = pred_ref[...].astype(jnp.float32)                 # (tile_m, tile_c)
    t = tgt_ref[...]                                      # (tile_m, 1) int32

    col_ids = jax.lax.broadcasted_iota(jnp.int32, (tile_m, tile_c), 1) + j * tile_c
    # Fused smoothed-target weights: sum_c w == 1 for every real row, so
    # sum_c w * log_softmax == sum_c (w * x) - logsumexp(x).
    w = jnp.where(col_ids == t, on_w, off_w)

    if c_ragged:
        # Only the last class block is ragged; mask garbage columns out of both
        # the logsumexp (-> -inf) and the weighted sum (-> 0).
        col_ok = col_ids < class_num
        wx = jnp.where(col_ok, w * x, 0.0)
        x = jnp.where(col_ok, x, -jnp.inf)
    else:
        wx = w * x

    blk_max = jnp.max(x, axis=-1, keepdims=True)          # (tile_m, 1)
    blk_ws = jnp.sum(wx, axis=-1, keepdims=True)          # (tile_m, 1)

    def finalize(lse, ws):
        # Rows past n_valid (ragged last row tile) may carry garbage / NaN in
        # lse/ws; the bit-wise select below discards them (NaN does not
        # propagate through the unselected operand).
        row_val = ws - lse                                 # sum_c w*log_softmax
        row_ids = jax.lax.broadcasted_iota(jnp.int32, (tile_m, 1), 0) + i * tile_m
        valid = row_ids < n_valid
        contrib = valid
        if ignore_index is not None:
            ign = (t == ignore_index) & valid
            contrib = contrib & jnp.logical_not(ign)
            cnt = jnp.sum(ign.astype(jnp.float32), axis=0, keepdims=True)
        else:
            cnt = jnp.zeros((1, 1), jnp.float32)
        loss = jnp.sum(jnp.where(contrib, -row_val, 0.0), axis=0, keepdims=True)
        loss_ref[...] = loss.reshape(1, 1, 1)
        cnt_ref[...] = cnt.reshape(1, 1, 1)

    if num_c_tiles == 1:
        # Single class block: direct logsumexp, no scratch round-trips.
        lse = blk_max + jnp.log(jnp.sum(jnp.exp(x - blk_max), axis=-1, keepdims=True))
        finalize(lse, blk_ws)
    else:
        m_sc, l_sc, ws_sc = scratch

        @pl.when(j == 0)
        def _():
            m_sc[...] = jnp.full_like(m_sc, -jnp.inf)
            l_sc[...] = jnp.zeros_like(l_sc)
            ws_sc[...] = jnp.zeros_like(ws_sc)

        # Online logsumexp over the class axis.
        m_prev = m_sc[...]
        m_new = jnp.maximum(m_prev, blk_max)
        l_sc[...] = (jnp.exp(m_prev - m_new) * l_sc[...]
                     + jnp.sum(jnp.exp(x - m_new), axis=-1, keepdims=True))
        m_sc[...] = m_new
        ws_sc[...] += blk_ws      # linear in x -> no max-rescaling needed

        @pl.when(j == num_c_tiles - 1)
        def _():
            finalize(m_sc[...] + jnp.log(l_sc[...]), ws_sc[...])


def _tpu_vmem_capacity(default_bytes=64 * 1024 * 1024):
    try:
        return int(pltpu.get_tpu_info().vmem_capacity_bytes)
    except Exception:
        return default_bytes      # conservative (v7x per-core VMEM)


def _per_row_bytes(tile_c, itemsize):
    # double-buffered predict block + ~4 live f32 full-width temporaries
    # + lane-padded (x128) target block / per-row scratch
    return 2 * tile_c * itemsize + 4 * tile_c * 4 + 8 * 128 * 4


def label_smoothing_cross_entropy(predict, target, *,
                                  ignore_index=None, label_smoothing=None,
                                  tile_m=None, tile_c=None,
                                  vmem_budget_bytes=None, vmem_limit_bytes=None):
    """Matches LabelSmoothingCrossEntropyLoss.forward (returns scalar loss)."""
    assert (predict.ndim == 3 and target.ndim == 2) or \
           (predict.ndim == 2 and target.ndim == 1)
    if label_smoothing is not None:
        assert 0 <= label_smoothing < 1
    if predict.ndim == 3:
        predict = predict.reshape(-1, predict.shape[-1])
        target = target.reshape(-1)

    n, c = predict.shape
    itemsize = jnp.dtype(predict.dtype).itemsize
    base = max(8, 32 // itemsize)            # sublane granule: 8 f32, 16 bf16

    phys_vmem = _tpu_vmem_capacity()
    if vmem_budget_bytes is None:
        vmem_budget_bytes = phys_vmem // 2          # 32 MiB v7x, 64 MiB v5e/v6e
    if vmem_limit_bytes is None:
        vmem_limit_bytes = (phys_vmem * 3) // 4     # 48 MiB v7x, 96 MiB v5e/v6e

    if tile_c is None:
        tile_c = c
        if (c > 2048 and
                _per_row_bytes(c, itemsize) * min(256, _round_up(n, base))
                > vmem_budget_bytes):
            tile_c = 2048                    # multiple of the 128-lane granule
    assert tile_c == c or tile_c % 128 == 0

    if tile_m is None:
        tile_m = max(base,
                     (vmem_budget_bytes // _per_row_bytes(tile_c, itemsize))
                     // base * base)
        tile_m = min(tile_m, _round_up(n, base))
    assert tile_m % base == 0 or tile_m == n

    num_row_tiles = _cdiv(n, tile_m)
    num_c_tiles = _cdiv(c, tile_c)
    c_ragged = (c % tile_c) != 0

    tgt_col = target.astype(jnp.int32).reshape(n, 1)

    kernel = functools.partial(
        _lsce_kernel,
        n_valid=n, class_num=c, tile_m=tile_m, tile_c=tile_c,
        num_c_tiles=num_c_tiles, label_smoothing=label_smoothing,
        ignore_index=ignore_index, c_ragged=c_ragged)

    scratch = []
    if num_c_tiles > 1:
        scratch = [pltpu.VMEM((tile_m, 1), jnp.float32)] * 3   # m, l, ws

    cost = pl.CostEstimate(
        flops=int(8 * n * c),
        transcendentals=int(n * c),
        bytes_accessed=int(n * c * itemsize + n * 4 + 8 * num_row_tiles))

    loss_parts, cnt_parts = pl.pallas_call(
        kernel,
        out_shape=(jax.ShapeDtypeStruct((num_row_tiles, 1, 1), jnp.float32),
                   jax.ShapeDtypeStruct((num_row_tiles, 1, 1), jnp.float32)),
        grid=(num_row_tiles, num_c_tiles),
        in_specs=[
            pl.BlockSpec((tile_m, tile_c), lambda i, j: (i, j)),
            pl.BlockSpec((tile_m, 1), lambda i, j: (i, 0)),
        ],
        out_specs=(
            pl.BlockSpec((1, 1, 1), lambda i, j: (i, 0, 0)),
            pl.BlockSpec((1, 1, 1), lambda i, j: (i, 0, 0)),
        ),
        scratch_shapes=scratch,
        compiler_params=pltpu.CompilerParams(
            dimension_semantics=("parallel", "arbitrary"),
            vmem_limit_bytes=int(vmem_limit_bytes)),
        cost_estimate=cost,
    )(predict, tgt_col)

    # Mean over non-ignored rows (batch_size - ignore_num, like PyTorch).
    # Note: if every target is ignored this divides by zero (NaN), matching
    # the PyTorch module.
    return jnp.sum(loss_parts) / (jnp.float32(n) - jnp.sum(cnt_parts))


def _reference(predict, target, ignore_index, label_smoothing):
    """Pure-JAX reference mirroring the PyTorch module (float32)."""
    if predict.ndim == 3:
        predict = predict.reshape(-1, predict.shape[-1])
        target = target.reshape(-1)
    n, c = predict.shape
    ls_t = jax.nn.one_hot(target, c, dtype=jnp.float32)
    if label_smoothing is not None and label_smoothing != 0:
        ls_t = ls_t * (1 - label_smoothing) + label_smoothing / c
    ignore_num = 0.0
    if ignore_index is not None:
        mask = (target == ignore_index)
        ignore_num = jnp.sum(mask).astype(jnp.float32)
        ls_t = jnp.where(mask[:, None], 0.0, ls_t)
    log_sm = jax.nn.log_softmax(predict.astype(jnp.float32), axis=-1)
    return -jnp.sum(log_sm * ls_t) / (n - ignore_num)


if __name__ == "__main__":
    key = jax.random.PRNGKey(0)
    k1, k2, k3, k4 = jax.random.split(key, 4)

    # Case 1: (B, S, C) logits + (B, S) targets, default tiling (single C block).
    B, S, C = 2, 8, 32
    IGNORE_INDEX, LABEL_SMOOTHING = 3, 0.1
    predict = jax.random.normal(k1, (B, S, C), dtype=jnp.float32)
    target = jax.random.randint(k2, (B, S), 0, C, dtype=jnp.int32)

    loss = label_smoothing_cross_entropy(
        predict, target, ignore_index=IGNORE_INDEX, label_smoothing=LABEL_SMOOTHING)
    loss = jax.block_until_ready(loss)
    ref = _reference(predict, target, IGNORE_INDEX, LABEL_SMOOTHING)
    assert jnp.allclose(loss, ref, rtol=1e-4, atol=1e-5), (loss, ref)

    # Case 2: 2-D input with forced small tiles to exercise the online-logsumexp
    # C-axis grid, ragged class blocks and ragged row blocks (no padding path).
    N2, C2 = 18, 160
    predict2 = jax.random.normal(k3, (N2, C2), dtype=jnp.float32)
    target2 = jax.random.randint(k4, (N2,), 0, C2, dtype=jnp.int32)

    loss2 = label_smoothing_cross_entropy(
        predict2, target2, ignore_index=0, label_smoothing=0.05,
        tile_m=8, tile_c=128)
    loss2 = jax.block_until_ready(loss2)
    ref2 = _reference(predict2, target2, 0, 0.05)
    assert jnp.allclose(loss2, ref2, rtol=1e-4, atol=1e-5), (loss2, ref2)

    print("KERNEL_OK")
</pallas_src>

<mosaic_0001>
module attributes {stable_mosaic.version = 11 : i64} {
  func.func @_lsce_kernel(%arg0: i32, %arg1: i32, %arg2: memref<16x32xf32, #tpu.memory_space<vmem>>, %arg3: memref<16x1xi32, #tpu.memory_space<vmem>>, %arg4: memref<1x1x1xf32, #tpu.memory_space<vmem>>, %arg5: memref<1x1x1xf32, #tpu.memory_space<vmem>>) attributes {dimension_semantics = [#tpu.dimension_semantics<parallel>, #tpu.dimension_semantics<arbitrary>], iteration_bounds = array<i64: 1, 1>, scalar_prefetch = 0 : i64, scratch_operands = 0 : i64, tpu.core_type = #tpu.core_type<tc>, window_params = [{transform_indices = @transform_0, window_bounds = array<i64: 16, 32>}, {transform_indices = @transform_1, window_bounds = array<i64: 16, 1>}, {transform_indices = @transform_2, window_bounds = array<i64: 1, 1, 1>}, {transform_indices = @transform_3, window_bounds = array<i64: 1, 1, 1>}]} {
    %c0 = arith.constant 0 : index
    %c0_0 = arith.constant 0 : index
    %0 = vector.load %arg2[%c0, %c0_0] : memref<16x32xf32, #tpu.memory_space<vmem>>, vector<16x32xf32>
    %c0_1 = arith.constant 0 : index
    %c0_2 = arith.constant 0 : index
    %1 = vector.load %arg3[%c0_1, %c0_2] : memref<16x1xi32, #tpu.memory_space<vmem>>, vector<16x1xi32>
    %2 = tpu.iota {dimensions = array<i32: 1>} : vector<16x32xi32>
    %c32_i32 = arith.constant 32 : i32
    %3 = arith.muli %arg1, %c32_i32 : i32
    %4 = vector.broadcast %3 : i32 to vector<16x32xi32>
    %5 = arith.addi %2, %4 : vector<16x32xi32>
    %6 = vector.broadcast %1 : vector<16x1xi32> to vector<16x32xi32>
    %7 = arith.cmpi eq, %5, %6 : vector<16x32xi32>
    %cst = arith.constant 0.903124988 : f32
    %cst_3 = arith.constant 3.125000e-03 : f32
    %8 = vector.broadcast %cst : f32 to vector<16x32xf32>
    %9 = vector.broadcast %cst_3 : f32 to vector<16x32xf32>
    %10 = arith.select %7, %8, %9 : vector<16x32xi1>, vector<16x32xf32>
    %11 = arith.mulf %10, %0 : vector<16x32xf32>
    %cst_4 = arith.constant dense<0xFF800000> : vector<16xf32>
    %12 = vector.multi_reduction <maximumf>, %0, %cst_4 [1] : vector<16x32xf32> to vector<16xf32>
    %13 = vector.shape_cast %12 : vector<16xf32> to vector<16x1xf32>
    %cst_5 = arith.constant dense<0.000000e+00> : vector<16xf32>
    %14 = vector.multi_reduction <add>, %11, %cst_5 [1] : vector<16x32xf32> to vector<16xf32>
    %15 = vector.shape_cast %14 : vector<16xf32> to vector<16x1xf32>
    %16 = vector.broadcast %13 : vector<16x1xf32> to vector<16x32xf32>
    %17 = arith.subf %0, %16 : vector<16x32xf32>
    %18 = math.exp %17 : vector<16x32xf32>
    %cst_6 = arith.constant dense<0.000000e+00> : vector<16xf32>
    %19 = vector.multi_reduction <add>, %18, %cst_6 [1] : vector<16x32xf32> to vector<16xf32>
    %20 = vector.shape_cast %19 : vector<16xf32> to vector<16x1xf32>
    %21 = math.log %20 : vector<16x1xf32>
    %22 = arith.addf %13, %21 : vector<16x1xf32>
    %23 = arith.subf %15, %22 : vector<16x1xf32>
    %24 = tpu.iota {dimensions = array<i32: 0>} : vector<16x1xi32>
    %c16_i32 = arith.constant 16 : i32
    %25 = arith.muli %arg0, %c16_i32 : i32
    %26 = vector.broadcast %25 : i32 to vector<16x1xi32>
    %27 = arith.addi %24, %26 : vector<16x1xi32>
    %c16_i32_7 = arith.constant 16 : i32
    %28 = vector.broadcast %c16_i32_7 : i32 to vector<16x1xi32>
    %29 = arith.cmpi slt, %27, %28 : vector<16x1xi32>
    %c3_i32 = arith.constant 3 : i32
    %30 = vector.broadcast %c3_i32 : i32 to vector<16x1xi32>
    %31 = arith.cmpi eq, %1, %30 : vector<16x1xi32>
    %32 = arith.andi %31, %29 : vector<16x1xi1>
    %cst_8 = arith.constant dense<true> : vector<16x1xi1>
    %33 = arith.xori %32, %cst_8 : vector<16x1xi1>
    %34 = arith.andi %29, %33 : vector<16x1xi1>
    %35 = arith.extui %32 : vector<16x1xi1> to vector<16x1xi32>
    %36 = arith.sitofp %35 : vector<16x1xi32> to vector<16x1xf32>
    %cst_9 = arith.constant dense<0.000000e+00> : vector<1xf32>
    %37 = vector.multi_reduction <add>, %36, %cst_9 [0] : vector<16x1xf32> to vector<1xf32>
    %38 = vector.shape_cast %37 : vector<1xf32> to vector<1x1xf32>
    %cst_10 = arith.constant 0.000000e+00 : f32
    %39 = vector.broadcast %cst_10 : f32 to vector<16x1xf32>
    %40 = arith.subf %39, %23 : vector<16x1xf32>
    %cst_11 = arith.constant 0.000000e+00 : f32
    %41 = vector.broadcast %cst_11 : f32 to vector<16x1xf32>
    %42 = arith.select %34, %40, %41 : vector<16x1xi1>, vector<16x1xf32>
    %cst_12 = arith.constant dense<0.000000e+00> : vector<1xf32>
    %43 = vector.multi_reduction <add>, %42, %cst_12 [0] : vector<16x1xf32> to vector<1xf32>
    %44 = vector.shape_cast %43 : vector<1xf32> to vector<1x1xf32>
    %45 = vector.shape_cast %44 : vector<1x1xf32> to vector<1x1x1xf32>
    %c0_13 = arith.constant 0 : index
    %c0_14 = arith.constant 0 : index
    %c0_15 = arith.constant 0 : index
    %46 = vector.load %arg4[%c0_13, %c0_14, %c0_15] : memref<1x1x1xf32, #tpu.memory_space<vmem>>, vector<1x1x1xf32>
    tpu.vector_store %arg4[%c0_13, %c0_14, %c0_15], %45 {strides = array<i32>} : memref<1x1x1xf32, #tpu.memory_space<vmem>>, vector<1x1x1xf32>,
    %47 = vector.shape_cast %38 : vector<1x1xf32> to vector<1x1x1xf32>
    %c0_16 = arith.constant 0 : index
    %c0_17 = arith.constant 0 : index
    %c0_18 = arith.constant 0 : index
    %48 = vector.load %arg5[%c0_16, %c0_17, %c0_18] : memref<1x1x1xf32, #tpu.memory_space<vmem>>, vector<1x1x1xf32>
    tpu.vector_store %arg5[%c0_16, %c0_17, %c0_18], %47 {strides = array<i32>} : memref<1x1x1xf32, #tpu.memory_space<vmem>>, vector<1x1x1xf32>,
    return
  }
  func.func @transform_0(%arg0: i32, %arg1: i32) -> (i32, i32) {
    %c0_i32 = arith.constant 0 : i32
    return %arg0, %arg1 : i32, i32
  }
  func.func @transform_1(%arg0: i32, %arg1: i32) -> (i32, i32) {
    %c0_i32 = arith.constant 0 : i32
    %c0_i32_0 = arith.constant 0 : i32
    return %arg0, %c0_i32 : i32, i32
  }
  func.func @transform_2(%arg0: i32, %arg1: i32) -> (i32, i32, i32) {
    %c0_i32 = arith.constant 0 : i32
    %c0_i32_0 = arith.constant 0 : i32
    %c0_i32_1 = arith.constant 0 : i32
    return %arg0, %c0_i32, %c0_i32_0 : i32, i32, i32
  }
  func.func @transform_3(%arg0: i32, %arg1: i32) -> (i32, i32, i32) {
    %c0_i32 = arith.constant 0 : i32
    %c0_i32_0 = arith.constant 0 : i32
    %c0_i32_1 = arith.constant 0 : i32
    return %arg0, %c0_i32, %c0_i32_0 : i32, i32, i32
  }
}

</mosaic_0001>

<bundles_post_ra>
// kernel: tpu_custom_call.1
= control target key start
LH: loop header
LB: loop body
LE: loop exit
PB: predicated region body
PF: predicated region fallthrough
CT: control target
= control target key end

     0   :  { %9 = vsyncpa [#allocation3], 0  ;;  %vm36_vm0 = vcmask 261120   ;;  %v206_v4 = vmov 0   ;;  %s278_s0 = inlined_call_operand.vmem [shape: f32[16,32], index: 0, kind: input, shape index: {}]   ;;  %s279_s1 = inlined_call_operand.vmem [shape: s32[16,1], index: 1, kind: input, shape index: {}]   ;;  %s280_s2 = inlined_call_operand.hbm [shape: f32[1,1,1], index: 2, kind: output, shape index: {0}]   ;;  %s281_s3 = inlined_call_operand.hbm [shape: f32[1,1,1], index: 3, kind: output, shape index: {1}]  }
   0x1   :  { %v15_v0 = vld [vmem:[%s278_s0] sm:$0xff]  ;;  %v16_v1 = vld [vmem:[%s278_s0 + $0x8] sm:$0xff]  ;;  %152 = vset.pattern.permute.xlu1 %v206_v4  ;;  %153 = vset.pattern.permute.xlu0 %v206_v4 }
   0x2   :  { %v241_v2 = vld [vmem:[%s279_s1] sm:$0xff]  ;;  %v37_v3 = vsel %vm36_vm0, %v15_v0, -inf  ;;  %v247_v5 = vld [vmem:[%s279_s1 + $0x8] sm:$0xff] }
   0x3   :  { %38 = vmax.xlane.f32.xlu0 %v37_v3  ;;  %25 = vperm.xlu1 %152, %v241_v2   ;;  %vm78_vm1 = vcmp.eq.s32.totalorder %v241_v2, 3  ;;  %vm79_vm2 = vcmp.eq.s32.totalorder %v247_v5, 3 }
   0x4   :  { %10 = vsyncpa [#allocation5], 0  ;;  %v40_v6 = vsel %vm36_vm0, %v16_v1, -inf  ;;  %vm90_vm3 = vcmask 7168   ;;  %v207_v7 = vmov 0.0   ;;  %v19_v16 = vlaneseq  ;;  %s209_s0 = smov [#allocation4]  }
   0x5   :  { %v144_v8 = vsel %vm78_vm1, 1.0, %v207_v7  ;;  %v145_v9 = vsel %vm79_vm2, 1.0, %v207_v7  ;;  %v208_v23 = vmov 0.003125   ;;  %vm113_vm6 = vcmask 0   ;;  %s132_s1 = sshll.u32 %s209_s0, 4  ;;  %s133_s1 = int_to_ptr.vmem [resolvable:$true] %s132_s1 }
   0x6   :  { %v91_v10 = vsel %vm90_vm3, %v144_v8, 0.0  ;;  %v92_v11 = vsel %vm90_vm3, %v145_v9, 0.0  ;;  %v20_v21 = vand.u32 127, %v19_v16  ;;  %s162_s20 = scalar_lea.vmem %s133_s1, 16  ;;  %s166_s21 = scalar_lea.vmem %s133_s1, 32 }
   0x7   :  { %v93_v12 = vadd.f32 %v92_v11, %v91_v10  ;;  %41 = vmax.xlane.f32.xlu0 %v40_v6  ;;  %28 = vperm.xlu1 %152, %v247_v5   ;;  %p163_p0 = scmp.ne.s32.totalorder %s133_s1, %s162_s20  ;;  %p167_p1 = scmp.lt.s32.totalorder %s133_s1, %s133_s1 }
   0x8   :  { %p168_p2 = scmp.lt.s32.totalorder %s166_s21, %s162_s20 }
   0x9   :  { %v94_v34 = vrot.slane %v93_v12, 4 }
   0xa   :  { %p169_p3 = por %p168_p2, %p167_p1 }
   0xb   :  { %v95_v35 = vadd.f32 %v94_v34, %v93_v12 }
   0xc   :  { %p170_p4 = pnand %p169_p3, %p163_p0 }
   0xd   :  { %v96_v36 = vrot.slane %v95_v35, 2 }
   0xf   :  { %v97_v37 = vadd.f32 %v96_v36, %v95_v35 }
  0x11   :  { %v98_v38 = vrot.slane %v97_v37, 1 }
  0x13   :  { %v99_v39 = vadd.f32 %v98_v38, %v97_v37 }
  0x15   :  { %115 = vst.msk [vmem:[#allocation4] sm:$0x1] %vm113_vm6, %v99_v39 }
  0x7e   :  { %v26_v19 = vpop.permute.xlu1 %25 }
  0x7f   :  { %vm30_vm4 = vcmp.eq.s32.totalorder %v20_v21, %v26_v19 }
  0x80   :  { %v32_v24 = vsel %vm30_vm4, 0.903125, %v208_v23 }
  0x81   :  { %v34_v25 = vmul.f32 %v32_v24, %v15_v0 }
  0x82   :  { %v29_v22 = vpop.permute.xlu1 %28 }
  0x83   :  { %vm31_vm5 = vcmp.eq.s32.totalorder %v20_v21, %v29_v22  ;;  %v43_v29 = vsel %vm36_vm0, %v34_v25, 0.0 }
  0x84   :  { %v33_v27 = vsel %vm31_vm5, 0.903125, %v208_v23 }
  0x85   :  { %v35_v30 = vmul.f32 %v33_v27, %v16_v1 }
  0x87   :  { %v46_v33 = vsel %vm36_vm0, %v35_v30, 0.0 }
  0x8c   :  { %v39_v13 = vpop.xlane.xlu0 %38 }
  0x8d   :  { %v49_v14 = vsub.f32 %v15_v0, %v39_v13 }
  0x8f   :  { %v51_v15 = vmul.f32 1.442695, %v49_v14 }
  0x90   :  { %v42_v17 = vpop.xlane.xlu0 %41 }
  0x91   :  { %154 = vpow2.f32 %v51_v15  ;;  %v50_v18 = vsub.f32 %v16_v1, %v42_v17 }
  0x93   :  { %v53_v20 = vmul.f32 1.442695, %v50_v18 }
  0x95   :  { %156 = vpow2.f32 %v53_v20 }
  0x9e   :  { %v155_v26 = vpop.eup %154 }
  0x9f   :  { %v55_v28 = vsel %vm36_vm0, %v155_v26, 0.0 }
  0xa0   :  { %56 = vadd.xlane.f32.xlu0 %v55_v28 }
  0xa2   :  { %v157_v31 = vpop.eup %156 }
  0xa3   :  { %v58_v32 = vsel %vm36_vm0, %v157_v31, 0.0 }
  0xa4   :  { %59 = vadd.xlane.f32.xlu1 %v58_v32  ;;  %44 = vadd.xlane.f32.xlu0 %v43_v29 }
  0xa8   :  { %47 = vadd.xlane.f32.xlu0 %v46_v33 }
  0xa9   :  { %173 = shalt.err (!%p170_p4)
}
  0xaa   :  { %135 = dma.vmem_to_hbm [thread:$0]  %s133_s1, 16, %s281_s3, [#allocation5]   ;;  %vm210_vm7 = vmmov 1  }
  0xab   :  { %vm82_vm8 = vmxor %vm78_vm1, %vm210_vm7  ;;  %s211_s3 = smov [#allocation2]  }
  0xac   :  { %vm83_vm9 = vmxor %vm79_vm2, %vm210_vm7  ;;  %s122_s24 = sshll.u32 %s211_s3, 4  ;;  %s123_s24 = int_to_ptr.vmem [resolvable:$true] %s122_s24 }
  0xad   :  { %s182_s25 = scalar_lea.vmem %s123_s24, 16  ;;  %s186_s26 = scalar_lea.vmem %s123_s24, 32 }
  0xae   :  { %p183_p5 = scmp.ne.s32.totalorder %s123_s24, %s182_s25  ;;  %p187_p6 = scmp.lt.s32.totalorder %s123_s24, %s123_s24 }
  0xaf   :  { %p188_p7 = scmp.lt.s32.totalorder %s186_s26, %s182_s25 }
  0xb1   :  { %p189_p8 = por %p188_p7, %p187_p6 }
  0xb3   :  { %p190_p9 = pnand %p189_p8, %p183_p5 }
 0x129   :  { %v57_v40 = vpop.xlane.xlu0 %56 }
 0x12a   :  { %158 = vlog2.f32 %v57_v40 }
 0x12d   :  { %v60_v41 = vpop.xlane.xlu1 %59  ;;  %v45_v44 = vpop.xlane.xlu0 %44 }
 0x12e   :  { %160 = vlog2.f32 %v60_v41 }
 0x131   :  { %v48_v51 = vpop.xlane.xlu0 %47 }
 0x137   :  { %v159_v42 = vpop.eup %158 }
 0x138   :  { %v62_v43 = vmul.f32 0.6931472, %v159_v42 }
 0x13a   :  { %v65_v45 = vadd.f32 %v62_v43, %v39_v13 }
 0x13b   :  { %v161_v46 = vpop.eup %160 }
 0x13c   :  { %v64_v47 = vmul.f32 0.6931472, %v161_v46  ;;  %v67_v48 = vsub.f32 %v45_v44, %v65_v45 }
 0x13e   :  { %v100_v49 = vsub.f32 0.0, %v67_v48  ;;  %v66_v50 = vadd.f32 %v64_v47, %v42_v17 }
 0x140   :  { %v68_v52 = vsub.f32 %v48_v51, %v66_v50  ;;  %v102_v53 = vsel %vm82_vm8, %v100_v49, 0.0 }
 0x141   :  { %v104_v56 = vsel %vm90_vm3, %v102_v53, 0.0 }
 0x142   :  { %v101_v54 = vsub.f32 0.0, %v68_v52 }
 0x144   :  { %v103_v55 = vsel %vm83_vm9, %v101_v54, 0.0 }
 0x145   :  { %v105_v57 = vsel %vm90_vm3, %v103_v55, 0.0 }
 0x146   :  { %v106_v58 = vadd.f32 %v105_v57, %v104_v56 }
 0x148   :  { %v107_v59 = vrot.slane %v106_v58, 4 }
 0x14a   :  { %v108_v60 = vadd.f32 %v107_v59, %v106_v58 }
 0x14c   :  { %v109_v61 = vrot.slane %v108_v60, 2 }
 0x14e   :  { %v110_v62 = vadd.f32 %v109_v61, %v108_v60 }
 0x150   :  { %v111_v63 = vrot.slane %v110_v62, 1 }
 0x152   :  { %v112_v0 = vadd.f32 %v111_v63, %v110_v62 }
 0x154   :  { %114 = vst.msk [vmem:[#allocation2] sm:$0x1] %vm113_vm6, %v112_v0 }
 0x155   :  { %193 = shalt.err (!%p190_p9)
}
 0x156   :  { %125 = dma.vmem_to_hbm [thread:$0]  %s123_s24, 16, %s280_s2, [#allocation3]  }
 0x157   :  { %202 = dma.done.wait [#allocation3], 16  }
 0x158   :  { %203 = vsyncadd [#allocation3], 4294967280 }
 0x159   :  { %204 = dma.done.wait [#allocation5], 16  }
 0x15a   :  { %205 = vsyncadd [#allocation5], 4294967280 }
 0x15b   :  { %142 = vsyncpa [#allocation3], 1 }
 0x15c   :  { %143 = vsyncpa [#allocation5], 1 }

</bundles_post_ra>
